<compile_context>
chip_gen: v6e
topology: v6e:2x2x1
jax: 0.10.0
libtpu: 0.0.40
codegen_flags: <defaults>
</compile_context>

<pallas_src>
import math
import functools

import jax
import jax.numpy as jnp
from jax.experimental import pallas as pl
from jax.experimental.pallas import tpu as pltpu


_LANE = 128
_SUBLANE = 16                 # row-tile granularity (covers bf16 sublane packing)
_MIB = 1024 * 1024


def _round_up(x, m):
    return (x + m - 1) // m * m


def _vmem_budget():
    """Generation-aware VMEM working-set budget (v5e/v6e: 128 MiB, v7x: 64 MiB)."""
    try:
        cap = int(pltpu.get_tpu_info().vmem_capacity_bytes)
    except Exception:
        cap = 64 * _MIB                      # conservative (v7x-sized) fallback
    budget = int(cap * 0.70)
    limit = min(int(cap * 0.85), 128 * _MIB)
    return budget, limit


def _resolve_gelu_mode(mode):
    """'erf' (exact, matches torch.erf formulation), 'tanh' (EUP-friendly), or 'auto'."""
    if mode in ("erf", "tanh"):
        return mode
    # auto: tanh-approx on v6e/v7x (VALU is the saturating slot next to the 900+
    # TF/s MXU); exact erf on v5e / unknown hardware.
    try:
        kind = jax.devices()[0].device_kind.lower()
    except Exception:
        return "erf"
    if ("v6" in kind) or ("v7" in kind) or ("7x" in kind):
        return "tanh"
    return "erf"


def _ffn_kernel(x_ref, w1_ref, b1_ref, w2_ref, b2_ref, gamma_ref, beta_ref,
                o_ref, acc_ref, *, eps, hidden_size, padded_hidden,
                compute_dtype, gelu_mode):
    k = pl.program_id(1)

    @pl.when(k == 0)
    def _init():
        acc_ref[...] = jnp.zeros_like(acc_ref)

    x = x_ref[...].astype(compute_dtype)

    # dense_1 (this slice of the inner dim): x @ W1[:, ks] + b1[ks]   (MXU, f32 acc)
    h = jnp.dot(x, w1_ref[...], preferred_element_type=jnp.float32)
    h = h + b1_ref[...].astype(jnp.float32)

    # GELU
    if gelu_mode == "tanh":
        # tanh-approx routes the expensive part to the EUP slot (free under MXU).
        h = jax.nn.gelu(h, approximate=True)
    else:
        # exact GELU: x * 0.5 * (1 + erf(x / sqrt(2)))  (matches torch.erf formulation)
        h = h * 0.5 * (1.0 + jax.lax.erf(h * (1.0 / math.sqrt(2.0))))
    # TODO(synk): v6e/v7x packed-bf16 bias+GELU epilogue (halves VALU passes) not wired in.

    # dense_2 partial product, accumulated over the inner-dim grid axis.
    acc_ref[...] += jnp.dot(h.astype(compute_dtype), w2_ref[...],
                            preferred_element_type=jnp.float32)

    @pl.when(k == pl.num_programs(1) - 1)
    def _finalize():
        # dropout: eval-mode identity.
        # TODO(synk): training-mode dropout (pltpu.prng_random_bits mask) not wired in.
        y = acc_ref[...] + b2_ref[...].astype(jnp.float32)
        y = y + x_ref[...].astype(jnp.float32)               # residual
        # NOTE: padded hidden lanes of y are EXACT zeros by construction
        # (zero-padded x rows, zero W2 columns, zero b2 padding), so the UNmasked
        # mean below is exact. Do not change the padding to non-zero values.
        inv_h = 1.0 / float(hidden_size)
        mean = jnp.sum(y, axis=-1, keepdims=True) * inv_h
        diff = y - mean
        if hidden_size != padded_hidden:                      # static (trace-time) skip
            lane_ids = jax.lax.broadcasted_iota(jnp.int32, (1, padded_hidden), 1)
            diff = diff * (lane_ids < hidden_size).astype(jnp.float32)
        var = jnp.sum(diff * diff, axis=-1, keepdims=True) * inv_h
        out = diff * jax.lax.rsqrt(var + eps)
        out = out * gamma_ref[...] + beta_ref[...]
        o_ref[...] = out.astype(o_ref.dtype)


def prepare_ffn_params(w1, b1, w2, b2, gamma, beta, *,
                       compute_dtype=jnp.bfloat16, inner_tile=None):
    """Pad + cast FeedForward parameters ONCE (hoisted out of the per-call path).

    w1: [H, I], w2: [I, H] (PyTorch Linear weights transposed to [in, out]);
    b1: [I]; b2, gamma, beta: [H]. Returns (params, meta).
    """
    H, I = w1.shape
    Hp = _round_up(H, _LANE)
    budget, vmem_limit = _vmem_budget()
    wsize = jnp.dtype(compute_dtype).itemsize

    Ip0 = _round_up(I, _LANE)
    if inner_tile is not None:
        tk = _round_up(int(inner_tile), _LANE)
    elif 2 * Hp * Ip0 * wsize <= budget // 2:
        tk = Ip0                              # whole weight set stays VMEM-resident
    else:
        # I-tiled fallback: per-step (double-buffered) weight slices ~40% of budget.
        tk = int(0.4 * budget) // (4 * Hp * wsize)
        tk = max(_LANE, min(2048, (tk // _LANE) * _LANE))
    Ip = _round_up(Ip0, tk)
    # TODO(synk): round Hp/Ip to 256 on v6e/v7x (2x256^2 MXU) for odd 128-multiples.

    params = dict(
        w1=jnp.pad(w1, ((0, Hp - H), (0, Ip - I))).astype(compute_dtype),
        w2=jnp.pad(w2, ((0, Ip - I), (0, Hp - H))).astype(compute_dtype),
        b1=jnp.pad(b1, (0, Ip - I)).reshape(1, Ip).astype(jnp.float32),
        b2=jnp.pad(b2, (0, Hp - H)).reshape(1, Hp).astype(jnp.float32),
        gamma=jnp.pad(gamma, (0, Hp - H)).reshape(1, Hp).astype(jnp.float32),
        beta=jnp.pad(beta, (0, Hp - H)).reshape(1, Hp).astype(jnp.float32),
    )
    meta = dict(H=int(H), I=int(I), Hp=int(Hp), Ip=int(Ip), tk=int(tk),
                compute_dtype=compute_dtype, wsize=int(wsize),
                budget=int(budget), vmem_limit=int(vmem_limit))
    return params, meta


def feed_forward(x, params, meta, *, eps=1e-12, tm=None, gelu_mode="auto"):
    """x: [B, S, H] (f32 or bf16 activations; output matches x.dtype)."""
    B, S, H = x.shape
    assert H == meta["H"], "hidden size mismatch with prepared params"
    Hp, Ip, tk = meta["Hp"], meta["Ip"], meta["tk"]
    cdt, wsize = meta["compute_dtype"], meta["wsize"]
    M = B * S
    n_k = Ip // tk

    # ---- row-tile selection: as large as the VMEM budget allows ---------------
    x_item = x.dtype.itemsize
    wbuf = 1 if n_k == 1 else 2
    fixed = wbuf * 2 * Hp * tk * wsize + wbuf * 8 * tk * 4 + 3 * 8 * Hp * 4

    def tile_bytes(t):
        return (2 * t * Hp * x_item        # x row tile (double-buffered)
                + 2 * t * Hp * x_item      # out row tile (double-buffered)
                + t * Hp * 4               # f32 accumulator scratch
                + 3 * t * tk * 4           # h / GELU f32 intermediates + headroom
                + t * tk * wsize)          # bf16 copy of h fed to dense_2

    tm_sel = 512 if tm is None else int(tm)
    tm_sel = max(_SUBLANE, min(_round_up(tm_sel, _SUBLANE), _round_up(M, _SUBLANE)))
    while tm_sel > _SUBLANE and fixed + tile_bytes(tm_sel) > meta["budget"]:
        tm_sel = max(_SUBLANE, _round_up(tm_sel // 2, _SUBLANE))

    n_m = pl.cdiv(M, tm_sel)
    if n_m == 1 and M >= 2 * _LANE:
        tm_sel = _round_up(pl.cdiv(M, 2), _SUBLANE)          # give both v7x TCs work
    elif n_m > 1 and n_m % 2 == 1 and M >= 2 * _LANE:
        tm_sel = _round_up(pl.cdiv(M, n_m + 1), _SUBLANE)    # even TC load balance
    n_m = pl.cdiv(M, tm_sel)
    Mp = n_m * tm_sel

    # ---- activations: only pad when it is not a no-op -------------------------
    x2 = x.reshape(M, H)
    if Mp != M or Hp != H:
        x2 = jnp.pad(x2, ((0, Mp - M), (0, Hp - H)))

    mode = _resolve_gelu_mode(gelu_mode)
    kernel = functools.partial(_ffn_kernel, eps=eps, hidden_size=H,
                               padded_hidden=Hp, compute_dtype=cdt,
                               gelu_mode=mode)

    cost = pl.CostEstimate(
        flops=4 * M * H * meta["I"],                          # two matmuls
        transcendentals=M * meta["I"],                        # erf/tanh per elem
        bytes_accessed=(2 * M * H * x_item
                        + 2 * H * meta["I"] * wsize
                        + (meta["I"] + 3 * H) * 4),
    )

    def build(single_buffer_invariant):
        def spec(shape, index_map, invariant):
            if invariant and single_buffer_invariant:
                # grid-invariant operands never need a second pipeline buffer
                return pl.BlockSpec(shape, index_map, pipeline_mode=pl.Buffered(1))
            return pl.BlockSpec(shape, index_map)

        in_specs = [
            pl.BlockSpec((tm_sel, Hp), lambda i, k: (i, 0)),              # x rows
            spec((Hp, tk), lambda i, k: (0, k), invariant=(n_k == 1)),    # W1 slice
            spec((1, tk), lambda i, k: (0, k), invariant=(n_k == 1)),     # b1 slice
            spec((tk, Hp), lambda i, k: (k, 0), invariant=(n_k == 1)),    # W2 slice
            spec((1, Hp), lambda i, k: (0, 0), invariant=True),           # b2
            spec((1, Hp), lambda i, k: (0, 0), invariant=True),           # gamma
            spec((1, Hp), lambda i, k: (0, 0), invariant=True),           # beta
        ]
        return pl.pallas_call(
            kernel,
            out_shape=jax.ShapeDtypeStruct((Mp, Hp), x.dtype),
            grid_spec=pltpu.PrefetchScalarGridSpec(
                num_scalar_prefetch=0,
                grid=(n_m, n_k),
                in_specs=in_specs,
                out_specs=pl.BlockSpec((tm_sel, Hp), lambda i, k: (i, 0)),
                scratch_shapes=[pltpu.VMEM((tm_sel, Hp), jnp.float32)],
            ),
            compiler_params=pltpu.CompilerParams(
                dimension_semantics=("parallel", "arbitrary"),
                vmem_limit_bytes=meta["vmem_limit"]),
            cost_estimate=cost,
        )

    args = (x2, params["w1"], params["b1"], params["w2"], params["b2"],
            params["gamma"], params["beta"])
    try:
        out = build(True)(*args)
    except Exception:
        # Portability fallback for builds rejecting single-buffered (pl.Buffered(1)) specs.
        out = build(False)(*args)

    if Mp != M or Hp != H:
        out = out[:M, :H]
    return out.reshape(B, S, H)


def _reference(x, w1, b1, w2, b2, gamma, beta, eps, *, gelu_mode="erf",
               compute_dtype=jnp.float32):
    """Pure-JAX reference mirroring the PyTorch forward (eval mode)."""
    hp = jax.lax.Precision.HIGHEST
    xc = x.astype(compute_dtype)
    h = jnp.dot(xc, w1.astype(compute_dtype), precision=hp,
                preferred_element_type=jnp.float32) + b1
    if gelu_mode == "tanh":
        h = jax.nn.gelu(h, approximate=True)
    else:
        h = h * 0.5 * (1.0 + jax.lax.erf(h * (1.0 / math.sqrt(2.0))))
    y = jnp.dot(h.astype(compute_dtype), w2.astype(compute_dtype), precision=hp,
                preferred_element_type=jnp.float32) + b2
    y = y + x
    mean = jnp.mean(y, axis=-1, keepdims=True)
    var = jnp.mean(jnp.square(y - mean), axis=-1, keepdims=True)
    return (y - mean) / jnp.sqrt(var + eps) * gamma + beta


def _make_inputs(key, B, S, H, I):
    kx, k1, kb1, k2, kb2, kg, kb = jax.random.split(key, 7)
    x = jax.random.normal(kx, (B, S, H), dtype=jnp.float32)
    # Dense weights stored as [in, out] (PyTorch Linear weight transposed).
    w1 = jax.random.normal(k1, (H, I), dtype=jnp.float32) * (1.0 / math.sqrt(H))
    b1 = jax.random.normal(kb1, (I,), dtype=jnp.float32) * 0.02
    w2 = jax.random.normal(k2, (I, H), dtype=jnp.float32) * (1.0 / math.sqrt(I))
    b2 = jax.random.normal(kb2, (H,), dtype=jnp.float32) * 0.02
    gamma = 1.0 + 0.1 * jax.random.normal(kg, (H,), dtype=jnp.float32)
    beta = 0.1 * jax.random.normal(kb, (H,), dtype=jnp.float32)
    return x, w1, b1, w2, b2, gamma, beta


if __name__ == "__main__":
    eps = 1e-12
    key = jax.random.PRNGKey(0)
    k_a, k_b = jax.random.split(key, 2)

    # ---- Config A: [2, 8, 32] hidden, inner 64; resident-weight path ----------
    x, w1, b1, w2, b2, gamma, beta = _make_inputs(k_a, B=2, S=8, H=32, I=64)

    params_f32, meta_f32 = prepare_ffn_params(w1, b1, w2, b2, gamma, beta,
                                              compute_dtype=jnp.float32)
    params_bf16, meta_bf16 = prepare_ffn_params(w1, b1, w2, b2, gamma, beta,
                                                compute_dtype=jnp.bfloat16)

    out_f32 = jax.block_until_ready(
        feed_forward(x, params_f32, meta_f32, eps=eps, gelu_mode="erf"))
    out_bf16 = jax.block_until_ready(
        feed_forward(x, params_bf16, meta_bf16, eps=eps, gelu_mode="erf"))
    auto_mode = _resolve_gelu_mode("auto")
    out_auto = jax.block_until_ready(
        feed_forward(x, params_bf16, meta_bf16, eps=eps, gelu_mode="auto"))

    ref_f32 = _reference(x, w1, b1, w2, b2, gamma, beta, eps, gelu_mode="erf")
    ref_bf16 = _reference(x, w1, b1, w2, b2, gamma, beta, eps, gelu_mode="erf",
                          compute_dtype=jnp.bfloat16)
    ref_auto = _reference(x, w1, b1, w2, b2, gamma, beta, eps, gelu_mode=auto_mode,
                          compute_dtype=jnp.bfloat16)

    assert out_f32.shape == (2, 8, 32)
    assert jnp.allclose(out_f32, ref_f32, atol=5e-5, rtol=5e-5), "A: f32 path mismatch"
    assert jnp.allclose(out_bf16, ref_bf16, atol=1e-2, rtol=1e-2), "A: bf16 path mismatch"
    assert jnp.allclose(out_bf16, ref_f32, atol=1e-1, rtol=1e-1), "A: bf16 drift vs f32"
    assert jnp.allclose(out_auto, ref_auto, atol=1e-2, rtol=1e-2), "A: auto-GELU mismatch"

    # ---- Config B: ragged rows + I-tiled accumulation path (2 inner steps) ----
    xb, w1b, b1b, w2b, b2b, gb, bb = _make_inputs(k_b, B=2, S=5, H=48, I=256)

    params_bt, meta_bt = prepare_ffn_params(w1b, b1b, w2b, b2b, gb, bb,
                                            compute_dtype=jnp.float32,
                                            inner_tile=128)     # forces n_k = 2
    assert meta_bt["Ip"] // meta_bt["tk"] == 2
    out_bt = jax.block_until_ready(
        feed_forward(xb, params_bt, meta_bt, eps=eps, gelu_mode="erf"))
    ref_bt = _reference(xb, w1b, b1b, w2b, b2b, gb, bb, eps, gelu_mode="erf")
    assert out_bt.shape == (2, 5, 48)
    assert jnp.allclose(out_bt, ref_bt, atol=5e-5, rtol=5e-5), "B: I-tiled f32 mismatch"

    params_bt16, meta_bt16 = prepare_ffn_params(w1b, b1b, w2b, b2b, gb, bb,
                                                compute_dtype=jnp.bfloat16,
                                                inner_tile=128)
    out_bt16 = jax.block_until_ready(
        feed_forward(xb, params_bt16, meta_bt16, eps=eps, gelu_mode="tanh"))
    ref_bt16 = _reference(xb, w1b, b1b, w2b, b2b, gb, bb, eps, gelu_mode="tanh",
                          compute_dtype=jnp.bfloat16)
    assert jnp.allclose(out_bt16, ref_bt16, atol=1e-2, rtol=1e-2), "B: tanh bf16 mismatch"

    print("KERNEL_OK")
</pallas_src>

<mosaic_0001>
module attributes {stable_mosaic.version = 11 : i64} {
  func.func @_ffn_kernel(%arg0: i32, %arg1: i32, %arg2: memref<16x128xf32, #tpu.memory_space<vmem>>, %arg3: memref<128x128xf32, #tpu.memory_space<vmem>>, %arg4: memref<1x128xf32, #tpu.memory_space<vmem>>, %arg5: memref<128x128xf32, #tpu.memory_space<vmem>>, %arg6: memref<1x128xf32, #tpu.memory_space<vmem>>, %arg7: memref<1x128xf32, #tpu.memory_space<vmem>>, %arg8: memref<1x128xf32, #tpu.memory_space<vmem>>, %arg9: memref<16x128xf32, #tpu.memory_space<vmem>>, %arg10: memref<16x128xf32, #tpu.memory_space<vmem>>) attributes {dimension_semantics = [#tpu.dimension_semantics<parallel>, #tpu.dimension_semantics<arbitrary>], iteration_bounds = array<i64: 1, 1>, scalar_prefetch = 0 : i64, scratch_operands = 1 : i64, tpu.core_type = #tpu.core_type<tc>, window_params = [{transform_indices = @transform_0, window_bounds = array<i64: 16, 128>}, {pipeline_mode = #tpu.pipeline_mode<synchronous>, transform_indices = @transform_1, window_bounds = array<i64: 128, 128>}, {pipeline_mode = #tpu.pipeline_mode<synchronous>, transform_indices = @transform_2, window_bounds = array<i64: 1, 128>}, {pipeline_mode = #tpu.pipeline_mode<synchronous>, transform_indices = @transform_3, window_bounds = array<i64: 128, 128>}, {pipeline_mode = #tpu.pipeline_mode<synchronous>, transform_indices = @transform_4, window_bounds = array<i64: 1, 128>}, {pipeline_mode = #tpu.pipeline_mode<synchronous>, transform_indices = @transform_5, window_bounds = array<i64: 1, 128>}, {pipeline_mode = #tpu.pipeline_mode<synchronous>, transform_indices = @transform_6, window_bounds = array<i64: 1, 128>}, {transform_indices = @transform_7, window_bounds = array<i64: 16, 128>}]} {
    %c0_i32 = arith.constant 0 : i32
    %0 = arith.cmpi eq, %arg1, %c0_i32 : i32
    %1 = arith.extui %0 : i1 to i32
    %c0_i32_0 = arith.constant 0 : i32
    %2 = arith.cmpi ne, %1, %c0_i32_0 : i32
    scf.if %2 {
      %cst_18 = arith.constant 0.000000e+00 : f32
      %25 = vector.broadcast %cst_18 : f32 to vector<16x128xf32>
      %c0_19 = arith.constant 0 : index
      %c0_20 = arith.constant 0 : index
      %26 = vector.load %arg10[%c0_19, %c0_20] : memref<16x128xf32, #tpu.memory_space<vmem>>, vector<16x128xf32>
      tpu.vector_store %arg10[%c0_19, %c0_20], %25 {strides = array<i32>} : memref<16x128xf32, #tpu.memory_space<vmem>>, vector<16x128xf32>,
    } else {
    }
    %c0 = arith.constant 0 : index
    %c0_1 = arith.constant 0 : index
    %3 = vector.load %arg2[%c0, %c0_1] : memref<16x128xf32, #tpu.memory_space<vmem>>, vector<16x128xf32>
    %c0_2 = arith.constant 0 : index
    %c0_3 = arith.constant 0 : index
    %4 = vector.load %arg3[%c0_2, %c0_3] : memref<128x128xf32, #tpu.memory_space<vmem>>, vector<128x128xf32>
    %cst = arith.constant dense<0.000000e+00> : vector<16x128xf32>
    %5 = tpu.matmul %3, %4, %cst {dimension_numbers = #tpu.dot_dimension_numbers<[1], [0], [0], [1], [0, 0, 1, 1], [], []>} : vector<16x128xf32>, vector<128x128xf32>, vector<16x128xf32> -> vector<16x128xf32>
    %c0_4 = arith.constant 0 : index
    %c0_5 = arith.constant 0 : index
    %6 = vector.load %arg4[%c0_4, %c0_5] : memref<1x128xf32, #tpu.memory_space<vmem>>, vector<1x128xf32>
    %7 = vector.broadcast %6 : vector<1x128xf32> to vector<16x128xf32>
    %8 = arith.addf %5, %7 : vector<16x128xf32>
    %cst_6 = arith.constant 5.000000e-01 : f32
    %9 = vector.broadcast %cst_6 : f32 to vector<16x128xf32>
    %10 = arith.mulf %8, %9 : vector<16x128xf32>
    %cst_7 = arith.constant 0.707106769 : f32
    %11 = vector.broadcast %cst_7 : f32 to vector<16x128xf32>
    %12 = arith.mulf %8, %11 : vector<16x128xf32>
    %13 = math.erf %12 : vector<16x128xf32>
    %cst_8 = arith.constant 1.000000e+00 : f32
    %14 = vector.broadcast %cst_8 : f32 to vector<16x128xf32>
    %15 = arith.addf %14, %13 : vector<16x128xf32>
    %16 = arith.mulf %10, %15 : vector<16x128xf32>
    %c0_9 = arith.constant 0 : index
    %c0_10 = arith.constant 0 : index
    %17 = vector.load %arg10[%c0_9, %c0_10] : memref<16x128xf32, #tpu.memory_space<vmem>>, vector<16x128xf32>
    %c0_11 = arith.constant 0 : index
    %c0_12 = arith.constant 0 : index
    %18 = vector.load %arg5[%c0_11, %c0_12] : memref<128x128xf32, #tpu.memory_space<vmem>>, vector<128x128xf32>
    %cst_13 = arith.constant dense<0.000000e+00> : vector<16x128xf32>
    %19 = tpu.matmul %16, %18, %cst_13 {dimension_numbers = #tpu.dot_dimension_numbers<[1], [0], [0], [1], [0, 0, 1, 1], [], []>} : vector<16x128xf32>, vector<128x128xf32>, vector<16x128xf32> -> vector<16x128xf32>
    %20 = arith.addf %17, %19 : vector<16x128xf32>
    %c0_14 = arith.constant 0 : index
    %c0_15 = arith.constant 0 : index
    %21 = vector.load %arg10[%c0_14, %c0_15] : memref<16x128xf32, #tpu.memory_space<vmem>>, vector<16x128xf32>
    tpu.vector_store %arg10[%c0_14, %c0_15], %20 {strides = array<i32>} : memref<16x128xf32, #tpu.memory_space<vmem>>, vector<16x128xf32>,
    %c0_i32_16 = arith.constant 0 : i32
    %22 = arith.cmpi eq, %arg1, %c0_i32_16 : i32
    %23 = arith.extui %22 : i1 to i32
    %c0_i32_17 = arith.constant 0 : i32
    %24 = arith.cmpi ne, %23, %c0_i32_17 : i32
    scf.if %24 {
      %c0_18 = arith.constant 0 : index
      %c0_19 = arith.constant 0 : index
      %25 = vector.load %arg10[%c0_18, %c0_19] : memref<16x128xf32, #tpu.memory_space<vmem>>, vector<16x128xf32>
      %c0_20 = arith.constant 0 : index
      %c0_21 = arith.constant 0 : index
      %26 = vector.load %arg6[%c0_20, %c0_21] : memref<1x128xf32, #tpu.memory_space<vmem>>, vector<1x128xf32>
      %27 = vector.broadcast %26 : vector<1x128xf32> to vector<16x128xf32>
      %28 = arith.addf %25, %27 : vector<16x128xf32>
      %c0_22 = arith.constant 0 : index
      %c0_23 = arith.constant 0 : index
      %29 = vector.load %arg2[%c0_22, %c0_23] : memref<16x128xf32, #tpu.memory_space<vmem>>, vector<16x128xf32>
      %30 = arith.addf %28, %29 : vector<16x128xf32>
      %cst_24 = arith.constant dense<0.000000e+00> : vector<16xf32>
      %31 = vector.multi_reduction <add>, %30, %cst_24 [1] : vector<16x128xf32> to vector<16xf32>
      %32 = vector.shape_cast %31 : vector<16xf32> to vector<16x1xf32>
      %cst_25 = arith.constant 3.125000e-02 : f32
      %33 = vector.broadcast %cst_25 : f32 to vector<16x1xf32>
      %34 = arith.mulf %32, %33 : vector<16x1xf32>
      %35 = vector.broadcast %34 : vector<16x1xf32> to vector<16x128xf32>
      %36 = arith.subf %30, %35 : vector<16x128xf32>
      %37 = tpu.iota {dimensions = array<i32: 1>} : vector<1x128xi32>
      %c32_i32 = arith.constant 32 : i32
      %38 = vector.broadcast %c32_i32 : i32 to vector<1x128xi32>
      %39 = arith.cmpi slt, %37, %38 : vector<1x128xi32>
      %40 = arith.extui %39 : vector<1x128xi1> to vector<1x128xi32>
      %41 = arith.sitofp %40 : vector<1x128xi32> to vector<1x128xf32>
      %42 = vector.broadcast %41 : vector<1x128xf32> to vector<16x128xf32>
      %43 = arith.mulf %36, %42 : vector<16x128xf32>
      %44 = arith.mulf %43, %43 : vector<16x128xf32>
      %cst_26 = arith.constant dense<0.000000e+00> : vector<16xf32>
      %45 = vector.multi_reduction <add>, %44, %cst_26 [1] : vector<16x128xf32> to vector<16xf32>
      %46 = vector.shape_cast %45 : vector<16xf32> to vector<16x1xf32>
      %cst_27 = arith.constant 3.125000e-02 : f32
      %47 = vector.broadcast %cst_27 : f32 to vector<16x1xf32>
      %48 = arith.mulf %46, %47 : vector<16x1xf32>
      %cst_28 = arith.constant 9.99999996E-13 : f32
      %49 = vector.broadcast %cst_28 : f32 to vector<16x1xf32>
      %50 = arith.addf %48, %49 : vector<16x1xf32>
      %51 = math.rsqrt %50 : vector<16x1xf32>
      %52 = vector.broadcast %51 : vector<16x1xf32> to vector<16x128xf32>
      %53 = arith.mulf %43, %52 : vector<16x128xf32>
      %c0_29 = arith.constant 0 : index
      %c0_30 = arith.constant 0 : index
      %54 = vector.load %arg7[%c0_29, %c0_30] : memref<1x128xf32, #tpu.memory_space<vmem>>, vector<1x128xf32>
      %55 = vector.broadcast %54 : vector<1x128xf32> to vector<16x128xf32>
      %56 = arith.mulf %53, %55 : vector<16x128xf32>
      %c0_31 = arith.constant 0 : index
      %c0_32 = arith.constant 0 : index
      %57 = vector.load %arg8[%c0_31, %c0_32] : memref<1x128xf32, #tpu.memory_space<vmem>>, vector<1x128xf32>
      %58 = vector.broadcast %57 : vector<1x128xf32> to vector<16x128xf32>
      %59 = arith.addf %56, %58 : vector<16x128xf32>
      %c0_33 = arith.constant 0 : index
      %c0_34 = arith.constant 0 : index
      %60 = vector.load %arg9[%c0_33, %c0_34] : memref<16x128xf32, #tpu.memory_space<vmem>>, vector<16x128xf32>
      tpu.vector_store %arg9[%c0_33, %c0_34], %59 {strides = array<i32>} : memref<16x128xf32, #tpu.memory_space<vmem>>, vector<16x128xf32>,
    } else {
    }
    return
  }
  func.func @transform_0(%arg0: i32, %arg1: i32) -> (i32, i32) {
    %c0_i32 = arith.constant 0 : i32
    %c0_i32_0 = arith.constant 0 : i32
    return %arg0, %c0_i32 : i32, i32
  }
  func.func @transform_1(%arg0: i32, %arg1: i32) -> (i32, i32) {
    %c0_i32 = arith.constant 0 : i32
    %c0_i32_0 = arith.constant 0 : i32
    return %c0_i32, %arg1 : i32, i32
  }
  func.func @transform_2(%arg0: i32, %arg1: i32) -> (i32, i32) {
    %c0_i32 = arith.constant 0 : i32
    %c0_i32_0 = arith.constant 0 : i32
    return %c0_i32, %arg1 : i32, i32
  }
  func.func @transform_3(%arg0: i32, %arg1: i32) -> (i32, i32) {
    %c0_i32 = arith.constant 0 : i32
    %c0_i32_0 = arith.constant 0 : i32
    return %arg1, %c0_i32 : i32, i32
  }
  func.func @transform_4(%arg0: i32, %arg1: i32) -> (i32, i32) {
    %c0_i32 = arith.constant 0 : i32
    %c0_i32_0 = arith.constant 0 : i32
    %c0_i32_1 = arith.constant 0 : i32
    return %c0_i32, %c0_i32_0 : i32, i32
  }
  func.func @transform_5(%arg0: i32, %arg1: i32) -> (i32, i32) {
    %c0_i32 = arith.constant 0 : i32
    %c0_i32_0 = arith.constant 0 : i32
    %c0_i32_1 = arith.constant 0 : i32
    return %c0_i32, %c0_i32_0 : i32, i32
  }
  func.func @transform_6(%arg0: i32, %arg1: i32) -> (i32, i32) {
    %c0_i32 = arith.constant 0 : i32
    %c0_i32_0 = arith.constant 0 : i32
    %c0_i32_1 = arith.constant 0 : i32
    return %c0_i32, %c0_i32_0 : i32, i32
  }
  func.func @transform_7(%arg0: i32, %arg1: i32) -> (i32, i32) {
    %c0_i32 = arith.constant 0 : i32
    %c0_i32_0 = arith.constant 0 : i32
    return %arg0, %c0_i32 : i32, i32
  }
}

module attributes {stable_mosaic.version = 11 : i64} {
  func.func @_ffn_kernel(%arg0: i32, %arg1: i32, %arg2: memref<16x128xf32, #tpu.memory_space<vmem>>, %arg3: memref<128x128xf32, #tpu.memory_space<vmem>>, %arg4: memref<1x128xf32, #tpu.memory_space<vmem>>, %arg5: memref<128x128xf32, #tpu.memory_space<vmem>>, %arg6: memref<1x128xf32, #tpu.memory_space<vmem>>, %arg7: memref<1x128xf32, #tpu.memory_space<vmem>>, %arg8: memref<1x128xf32, #tpu.memory_space<vmem>>, %arg9: memref<16x128xf32, #tpu.memory_space<vmem>>, %arg10: memref<16x128xf32, #tpu.memory_space<vmem>>) attributes {dimension_semantics = [#tpu.dimension_semantics<parallel>, #tpu.dimension_semantics<arbitrary>], iteration_bounds = array<i64: 1, 1>, scalar_prefetch = 0 : i64, scratch_operands = 1 : i64, tpu.core_type = #tpu.core_type<tc>, window_params = [{transform_indices = @transform_0, window_bounds = array<i64: 16, 128>}, {transform_indices = @transform_1, window_bounds = array<i64: 128, 128>}, {transform_indices = @transform_2, window_bounds = array<i64: 1, 128>}, {transform_indices = @transform_3, window_bounds = array<i64: 128, 128>}, {pipeline_mode = #tpu.pipeline_mode<synchronous>, transform_indices = @transform_4, window_bounds = array<i64: 1, 128>}, {pipeline_mode = #tpu.pipeline_mode<synchronous>, transform_indices = @transform_5, window_bounds = array<i64: 1, 128>}, {pipeline_mode = #tpu.pipeline_mode<synchronous>, transform_indices = @transform_6, window_bounds = array<i64: 1, 128>}, {transform_indices = @transform_7, window_bounds = array<i64: 16, 128>}]} {
    %c0_i32 = arith.constant 0 : i32
    %0 = arith.cmpi eq, %arg1, %c0_i32 : i32
    %1 = arith.extui %0 : i1 to i32
    %c0_i32_0 = arith.constant 0 : i32
    %2 = arith.cmpi ne, %1, %c0_i32_0 : i32
    scf.if %2 {
      %cst_18 = arith.constant 0.000000e+00 : f32
      %25 = vector.broadcast %cst_18 : f32 to vector<16x128xf32>
      %c0_19 = arith.constant 0 : index
      %c0_20 = arith.constant 0 : index
      %26 = vector.load %arg10[%c0_19, %c0_20] : memref<16x128xf32, #tpu.memory_space<vmem>>, vector<16x128xf32>
      tpu.vector_store %arg10[%c0_19, %c0_20], %25 {strides = array<i32>} : memref<16x128xf32, #tpu.memory_space<vmem>>, vector<16x128xf32>,
    } else {
    }
    %c0 = arith.constant 0 : index
    %c0_1 = arith.constant 0 : index
    %3 = vector.load %arg2[%c0, %c0_1] : memref<16x128xf32, #tpu.memory_space<vmem>>, vector<16x128xf32>
    %c0_2 = arith.constant 0 : index
    %c0_3 = arith.constant 0 : index
    %4 = vector.load %arg3[%c0_2, %c0_3] : memref<128x128xf32, #tpu.memory_space<vmem>>, vector<128x128xf32>
    %cst = arith.constant dense<0.000000e+00> : vector<16x128xf32>
    %5 = tpu.matmul %3, %4, %cst {dimension_numbers = #tpu.dot_dimension_numbers<[1], [0], [0], [1], [0, 0, 1, 1], [], []>} : vector<16x128xf32>, vector<128x128xf32>, vector<16x128xf32> -> vector<16x128xf32>
    %c0_4 = arith.constant 0 : index
    %c0_5 = arith.constant 0 : index
    %6 = vector.load %arg4[%c0_4, %c0_5] : memref<1x128xf32, #tpu.memory_space<vmem>>, vector<1x128xf32>
    %7 = vector.broadcast %6 : vector<1x128xf32> to vector<16x128xf32>
    %8 = arith.addf %5, %7 : vector<16x128xf32>
    %cst_6 = arith.constant 5.000000e-01 : f32
    %9 = vector.broadcast %cst_6 : f32 to vector<16x128xf32>
    %10 = arith.mulf %8, %9 : vector<16x128xf32>
    %cst_7 = arith.constant 0.707106769 : f32
    %11 = vector.broadcast %cst_7 : f32 to vector<16x128xf32>
    %12 = arith.mulf %8, %11 : vector<16x128xf32>
    %13 = math.erf %12 : vector<16x128xf32>
    %cst_8 = arith.constant 1.000000e+00 : f32
    %14 = vector.broadcast %cst_8 : f32 to vector<16x128xf32>
    %15 = arith.addf %14, %13 : vector<16x128xf32>
    %16 = arith.mulf %10, %15 : vector<16x128xf32>
    %c0_9 = arith.constant 0 : index
    %c0_10 = arith.constant 0 : index
    %17 = vector.load %arg10[%c0_9, %c0_10] : memref<16x128xf32, #tpu.memory_space<vmem>>, vector<16x128xf32>
    %c0_11 = arith.constant 0 : index
    %c0_12 = arith.constant 0 : index
    %18 = vector.load %arg5[%c0_11, %c0_12] : memref<128x128xf32, #tpu.memory_space<vmem>>, vector<128x128xf32>
    %cst_13 = arith.constant dense<0.000000e+00> : vector<16x128xf32>
    %19 = tpu.matmul %16, %18, %cst_13 {dimension_numbers = #tpu.dot_dimension_numbers<[1], [0], [0], [1], [0, 0, 1, 1], [], []>} : vector<16x128xf32>, vector<128x128xf32>, vector<16x128xf32> -> vector<16x128xf32>
    %20 = arith.addf %17, %19 : vector<16x128xf32>
    %c0_14 = arith.constant 0 : index
    %c0_15 = arith.constant 0 : index
    %21 = vector.load %arg10[%c0_14, %c0_15] : memref<16x128xf32, #tpu.memory_space<vmem>>, vector<16x128xf32>
    tpu.vector_store %arg10[%c0_14, %c0_15], %20 {strides = array<i32>} : memref<16x128xf32, #tpu.memory_space<vmem>>, vector<16x128xf32>,
    %c0_i32_16 = arith.constant 0 : i32
    %22 = arith.cmpi eq, %arg1, %c0_i32_16 : i32
    %23 = arith.extui %22 : i1 to i32
    %c0_i32_17 = arith.constant 0 : i32
    %24 = arith.cmpi ne, %23, %c0_i32_17 : i32
    scf.if %24 {
      %c0_18 = arith.constant 0 : index
      %c0_19 = arith.constant 0 : index
      %25 = vector.load %arg10[%c0_18, %c0_19] : memref<16x128xf32, #tpu.memory_space<vmem>>, vector<16x128xf32>
      %c0_20 = arith.constant 0 : index
      %c0_21 = arith.constant 0 : index
      %26 = vector.load %arg6[%c0_20, %c0_21] : memref<1x128xf32, #tpu.memory_space<vmem>>, vector<1x128xf32>
      %27 = vector.broadcast %26 : vector<1x128xf32> to vector<16x128xf32>
      %28 = arith.addf %25, %27 : vector<16x128xf32>
      %c0_22 = arith.constant 0 : index
      %c0_23 = arith.constant 0 : index
      %29 = vector.load %arg2[%c0_22, %c0_23] : memref<16x128xf32, #tpu.memory_space<vmem>>, vector<16x128xf32>
      %30 = arith.addf %28, %29 : vector<16x128xf32>
      %cst_24 = arith.constant dense<0.000000e+00> : vector<16xf32>
      %31 = vector.multi_reduction <add>, %30, %cst_24 [1] : vector<16x128xf32> to vector<16xf32>
      %32 = vector.shape_cast %31 : vector<16xf32> to vector<16x1xf32>
      %cst_25 = arith.constant 3.125000e-02 : f32
      %33 = vector.broadcast %cst_25 : f32 to vector<16x1xf32>
      %34 = arith.mulf %32, %33 : vector<16x1xf32>
      %35 = vector.broadcast %34 : vector<16x1xf32> to vector<16x128xf32>
      %36 = arith.subf %30, %35 : vector<16x128xf32>
      %37 = tpu.iota {dimensions = array<i32: 1>} : vector<1x128xi32>
      %c32_i32 = arith.constant 32 : i32
      %38 = vector.broadcast %c32_i32 : i32 to vector<1x128xi32>
      %39 = arith.cmpi slt, %37, %38 : vector<1x128xi32>
      %40 = arith.extui %39 : vector<1x128xi1> to vector<1x128xi32>
      %41 = arith.sitofp %40 : vector<1x128xi32> to vector<1x128xf32>
      %42 = vector.broadcast %41 : vector<1x128xf32> to vector<16x128xf32>
      %43 = arith.mulf %36, %42 : vector<16x128xf32>
      %44 = arith.mulf %43, %43 : vector<16x128xf32>
      %cst_26 = arith.constant dense<0.000000e+00> : vector<16xf32>
      %45 = vector.multi_reduction <add>, %44, %cst_26 [1] : vector<16x128xf32> to vector<16xf32>
      %46 = vector.shape_cast %45 : vector<16xf32> to vector<16x1xf32>
      %cst_27 = arith.constant 3.125000e-02 : f32
      %47 = vector.broadcast %cst_27 : f32 to vector<16x1xf32>
      %48 = arith.mulf %46, %47 : vector<16x1xf32>
      %cst_28 = arith.constant 9.99999996E-13 : f32
      %49 = vector.broadcast %cst_28 : f32 to vector<16x1xf32>
      %50 = arith.addf %48, %49 : vector<16x1xf32>
      %51 = math.rsqrt %50 : vector<16x1xf32>
      %52 = vector.broadcast %51 : vector<16x1xf32> to vector<16x128xf32>
      %53 = arith.mulf %43, %52 : vector<16x128xf32>
      %c0_29 = arith.constant 0 : index
      %c0_30 = arith.constant 0 : index
      %54 = vector.load %arg7[%c0_29, %c0_30] : memref<1x128xf32, #tpu.memory_space<vmem>>, vector<1x128xf32>
      %55 = vector.broadcast %54 : vector<1x128xf32> to vector<16x128xf32>
      %56 = arith.mulf %53, %55 : vector<16x128xf32>
      %c0_31 = arith.constant 0 : index
      %c0_32 = arith.constant 0 : index
      %57 = vector.load %arg8[%c0_31, %c0_32] : memref<1x128xf32, #tpu.memory_space<vmem>>, vector<1x128xf32>
      %58 = vector.broadcast %57 : vector<1x128xf32> to vector<16x128xf32>
      %59 = arith.addf %56, %58 : vector<16x128xf32>
      %c0_33 = arith.constant 0 : index
      %c0_34 = arith.constant 0 : index
      %60 = vector.load %arg9[%c0_33, %c0_34] : memref<16x128xf32, #tpu.memory_space<vmem>>, vector<16x128xf32>
      tpu.vector_store %arg9[%c0_33, %c0_34], %59 {strides = array<i32>} : memref<16x128xf32, #tpu.memory_space<vmem>>, vector<16x128xf32>,
    } else {
    }
    return
  }
  func.func @transform_0(%arg0: i32, %arg1: i32) -> (i32, i32) {
    %c0_i32 = arith.constant 0 : i32
    %c0_i32_0 = arith.constant 0 : i32
    return %arg0, %c0_i32 : i32, i32
  }
  func.func @transform_1(%arg0: i32, %arg1: i32) -> (i32, i32) {
    %c0_i32 = arith.constant 0 : i32
    %c0_i32_0 = arith.constant 0 : i32
    return %c0_i32, %arg1 : i32, i32
  }
  func.func @transform_2(%arg0: i32, %arg1: i32) -> (i32, i32) {
    %c0_i32 = arith.constant 0 : i32
    %c0_i32_0 = arith.constant 0 : i32
    return %c0_i32, %arg1 : i32, i32
  }
  func.func @transform_3(%arg0: i32, %arg1: i32) -> (i32, i32) {
    %c0_i32 = arith.constant 0 : i32
    %c0_i32_0 = arith.constant 0 : i32
    return %arg1, %c0_i32 : i32, i32
  }
  func.func @transform_4(%arg0: i32, %arg1: i32) -> (i32, i32) {
    %c0_i32 = arith.constant 0 : i32
    %c0_i32_0 = arith.constant 0 : i32
    %c0_i32_1 = arith.constant 0 : i32
    return %c0_i32, %c0_i32_0 : i32, i32
  }
  func.func @transform_5(%arg0: i32, %arg1: i32) -> (i32, i32) {
    %c0_i32 = arith.constant 0 : i32
    %c0_i32_0 = arith.constant 0 : i32
    %c0_i32_1 = arith.constant 0 : i32
    return %c0_i32, %c0_i32_0 : i32, i32
  }
  func.func @transform_6(%arg0: i32, %arg1: i32) -> (i32, i32) {
    %c0_i32 = arith.constant 0 : i32
    %c0_i32_0 = arith.constant 0 : i32
    %c0_i32_1 = arith.constant 0 : i32
    return %c0_i32, %c0_i32_0 : i32, i32
  }
  func.func @transform_7(%arg0: i32, %arg1: i32) -> (i32, i32) {
    %c0_i32 = arith.constant 0 : i32
    %c0_i32_0 = arith.constant 0 : i32
    return %arg0, %c0_i32 : i32, i32
  }
}

</mosaic_0001>

<bundles_post_ra>
// kernel: tpu_custom_call.1
= control target key start
LH: loop header
LB: loop body
LE: loop exit
PB: predicated region body
PF: predicated region fallthrough
CT: control target
= control target key end

     0   :  { %12 = vsyncpa [#allocation4], 0  ;;  %s669_s0 = inlined_call_operand.hbm [shape: f32[16,128], index: 0, kind: input, shape index: {}]   ;;  %s670_s1 = inlined_call_operand.hbm [shape: f32[128,128], index: 1, kind: input, shape index: {}]   ;;  %s671_s2 = inlined_call_operand.vmem [shape: f32[1,128], index: 2, kind: input, shape index: {}]   ;;  %s672_s3 = inlined_call_operand.hbm [shape: f32[128,128], index: 3, kind: input, shape index: {}]   ;;  %s673_s4 = inlined_call_operand.vmem [shape: f32[1,128], index: 4, kind: input, shape index: {}]   ;;  %s674_s5 = inlined_call_operand.vmem [shape: f32[1,128], index: 5, kind: input, shape index: {}]   ;;  %s675_s6 = inlined_call_operand.vmem [shape: f32[1,128], index: 6, kind: input, shape index: {}]   ;;  %s676_s7 = inlined_call_operand.hbm [shape: f32[16,128], index: 7, kind: output, shape index: {}]  }
   0x1   :  { %13 = vsyncpa [#allocation7], 0 }
   0x2   :  { %14 = vsyncpa [#allocation5], 0  ;;  %s578_s24 = smov [#allocation6]   ;;  %s579_s26 = smov [#allocation3]  }
   0x3   :  { %s32_s25 = sshll.u32 %s578_s24, 4  ;;  %s20_s27 = sshll.u32 %s579_s26, 4  ;;  %s33_s25 = int_to_ptr.vmem [resolvable:$true] %s32_s25  ;;  %s21_s27 = int_to_ptr.vmem [resolvable:$true] %s20_s27 }
   0x4   :  { %s500_s28 = scalar_lea.vmem %s33_s25, 2048  ;;  %p505_p1 = scmp.lt.s32.totalorder %s33_s25, %s33_s25 }
   0x5   :  { %p501_p0 = scmp.ne.s32.totalorder %s33_s25, %s500_s28  ;;  %p506_p2 = scmp.lt.s32.totalorder %s500_s28, %s500_s28 }
   0x7   :  { %p507_p3 = por %p506_p2, %p505_p1 }
   0x9   :  { %p508_p4 = pnand %p507_p3, %p501_p0 }
   0xb   :  { %511 = shalt.err (!%p508_p4)
}
   0xc   :  { %s580_s29 = smov 128   ;;  %s581_s30 = smov 8  }
   0xd   :  { %38 = dma.hbm_to_vmem [thread:$0]  %s670_s1, 2048, %s33_s25, [#allocation7], %s580_s29, %s580_s29, %s581_s30  }
   0xe   :  { %s520_s10 = scalar_lea.vmem %s21_s27, 256  ;;  %p525_p6 = scmp.lt.s32.totalorder %s21_s27, %s21_s27 }
   0xf   :  { %p521_p5 = scmp.ne.s32.totalorder %s21_s27, %s520_s10  ;;  %p526_p7 = scmp.lt.s32.totalorder %s520_s10, %s520_s10 }
  0x11   :  { %p527_p8 = por %p526_p7, %p525_p6 }
  0x13   :  { %p528_p9 = pnand %p527_p8, %p521_p5 }
  0x15   :  { %531 = shalt.err (!%p528_p9)
}
  0x16   :  { %26 = dma.hbm_to_vmem [thread:$0]  %s669_s0, 256, %s21_s27, [#allocation4], %s580_s29, %s580_s29, %s581_s30  }
  0x17   :  { %s582_s13 = smov [#allocation8]  }
  0x18   :  { %s46_s14 = sshll.u32 %s582_s13, 4  ;;  %s47_s14 = int_to_ptr.vmem [resolvable:$true] %s46_s14 }
  0x19   :  { %s540_s15 = scalar_lea.vmem %s47_s14, 2048  ;;  %p545_p11 = scmp.lt.s32.totalorder %s47_s14, %s47_s14 }
  0x1a   :  { %p541_p10 = scmp.ne.s32.totalorder %s47_s14, %s540_s15  ;;  %p546_p12 = scmp.lt.s32.totalorder %s540_s15, %s540_s15 }
  0x1c   :  { %p547_p13 = por %p546_p12, %p545_p11 }
  0x1e   :  { %p548_p0 = pnand %p547_p13, %p541_p10 }
  0x20   :  { %551 = shalt.err (!%p548_p0)
}
  0x21   :  { %52 = dma.hbm_to_vmem [thread:$0]  %s672_s3, 2048, %s47_s14, [#allocation7], %s580_s29, %s580_s29, %s581_s30  }
  0x22   :  { %572 = dma.done.wait [#allocation4], 256  }
  0x23   :  { %573 = vsyncadd [#allocation4], 4294967040 }
  0x24   :  { %574 = dma.done.wait [#allocation7], 4096  }
  0x25   :  { %575 = vsyncadd [#allocation7], 4294963200  ;;  %v91_v0 = vld [vmem:[#allocation6 + $0x78] sm:$0xff]  ;;  %v90_v1 = vld [vmem:[#allocation6 + $0x70] sm:$0xff]  ;;  %v307_v56 = vlaneseq  ;;  %v583_v60 = vmov 0.0   ;;  %s584_s21 = smov [#allocation9]  }
  0x26   :  { %407 = vmatprep.subr.mxu0 %v91_v0  ;;  %v89_v2 = vld [vmem:[#allocation6 + $0x68] sm:$0xff]  ;;  %v88_v3 = vld [vmem:[#allocation6 + $0x60] sm:$0xff]  ;;  %v643_v4 = vld [vmem:[#allocation3] sm:$0xff]  ;;  %s353_s22 = sshll.u32 %s584_s21, 4  ;;  %s354_s22 = int_to_ptr.vmem [resolvable:$true] %s353_s22 }
  0x27   :  { %408 = vmatpush3.msra.mxu0 %v91_v0  ;;  %v87_v5 = vld [vmem:[#allocation6 + $0x58] sm:$0xff]  ;;  %439 = vmatprep.mubr.f32.mxu0 %v643_v4  ;;  %v200_v7 = vld [vmem:[#allocation8 + $0x70] sm:$0xff]  ;;  %v199_v9 = vld [vmem:[#allocation8 + $0x68] sm:$0xff]  ;;  %v308_v57 = vand.u32 127, %v307_v56  ;;  %s552_s23 = scalar_lea.vmem %s354_s22, 256  ;;  %p557_p2 = scmp.lt.s32.totalorder %s354_s22, %s354_s22 }
  0x28   :  { %409 = vmatprep.subr.mxu0 %v90_v1  ;;  %v201_v6 = vld [vmem:[#allocation8 + $0x78] sm:$0xff]  ;;  %v86_v8 = vld [vmem:[#allocation6 + $0x50] sm:$0xff]  ;;  %v85_v10 = vld [vmem:[#allocation6 + $0x48] sm:$0xff]  ;;  %p553_p1 = scmp.ne.s32.totalorder %s354_s22, %s552_s23  ;;  %p558_p3 = scmp.lt.s32.totalorder %s552_s23, %s552_s23 }
  0x29   :  { %410 = vmatpush3.msra.mxu0 %v90_v1  ;;  %442 = vmatprep.subr.mxu1 %v201_v6  ;;  %v84_v11 = vld [vmem:[#allocation6 + $0x40] sm:$0xff]  ;;  %v83_v12 = vld [vmem:[#allocation6 + $0x38] sm:$0xff]  ;;  %v82_v13 = vld [vmem:[#allocation6 + $0x30] sm:$0xff]  ;;  %vm309_vm0 = vcmp.lt.s32.totalorder %v308_v57, 32 }
  0x2a   :  { %411 = vmatprep.subr.mxu0 %v89_v2  ;;  %443 = vmatpush3.msra.mxu1 %v201_v6  ;;  %v81_v14 = vld [vmem:[#allocation6 + $0x28] sm:$0xff]  ;;  %v80_v15 = vld [vmem:[#allocation6 + $0x20] sm:$0xff]  ;;  %v79_v16 = vld [vmem:[#allocation6 + $0x18] sm:$0xff]  ;;  %v368_v61 = vsel %vm309_vm0, 1.0, %v583_v60  ;;  %p559_p4 = por %p558_p3, %p557_p2 }
  0x2b   :  { %412 = vmatpush3.msra.mxu0 %v89_v2  ;;  %444 = vmatprep.subr.mxu1 %v200_v7  ;;  %v78_v17 = vld [vmem:[#allocation6 + $0x10] sm:$0xff]  ;;  %v77_v18 = vld [vmem:[#allocation6 + $0x8] sm:$0xff]  ;;  %v76_v19 = vld [vmem:[#allocation6] sm:$0xff] }
  0x2c   :  { %413 = vmatprep.subr.mxu0 %v88_v3  ;;  %445 = vmatpush3.msra.mxu1 %v200_v7  ;;  %v646_v20 = vld [vmem:[#allocation3 + $0x8] sm:$0xff]  ;;  %v198_v21 = vld [vmem:[#allocation8 + $0x60] sm:$0xff]  ;;  %v196_v23 = vld [vmem:[#allocation8 + $0x50] sm:$0xff]  ;;  %p560_p5 = pnand %p559_p4, %p553_p1 }
  0x2d   :  { %414 = vmatpush3.msra.mxu0 %v88_v3  ;;  %446 = vmatprep.subr.mxu1 %v199_v9  ;;  %v197_v22 = vld [vmem:[#allocation8 + $0x58] sm:$0xff]  ;;  %v195_v24 = vld [vmem:[#allocation8 + $0x48] sm:$0xff]  ;;  %v194_v25 = vld [vmem:[#allocation8 + $0x40] sm:$0xff] }
  0x2e   :  { %415 = vmatprep.subr.mxu0 %v87_v5  ;;  %447 = vmatpush3.msra.mxu1 %v199_v9  ;;  %v193_v26 = vld [vmem:[#allocation8 + $0x38] sm:$0xff]  ;;  %v192_v27 = vld [vmem:[#allocation8 + $0x30] sm:$0xff]  ;;  %v191_v28 = vld [vmem:[#allocation8 + $0x28] sm:$0xff] }
  0x2f   :  { %416 = vmatpush3.msra.mxu0 %v87_v5  ;;  %448 = vmatprep.subr.mxu1 %v198_v21  ;;  %v190_v29 = vld [vmem:[#allocation8 + $0x20] sm:$0xff]  ;;  %v189_v30 = vld [vmem:[#allocation8 + $0x18] sm:$0xff]  ;;  %v188_v31 = vld [vmem:[#allocation8 + $0x10] sm:$0xff] }
  0x30   :  { %417 = vmatprep.subr.mxu0 %v86_v8  ;;  %449 = vmatpush3.msra.mxu1 %v198_v21  ;;  %v187_v32 = vld [vmem:[#allocation8 + $0x8] sm:$0xff]  ;;  %v186_v33 = vld [vmem:[#allocation8] sm:$0xff]  ;;  %v366_v34 = vld [vmem:[%s671_s2] ss:$0 sm:$0xff] }
  0x31   :  { %418 = vmatpush3.msra.mxu0 %v86_v8  ;;  %450 = vmatprep.subr.mxu1 %v197_v22  ;;  %v367_v50 = vld [vmem:[%s673_s4] ss:$0 sm:$0xff] }
  0x32   :  { %419 = vmatprep.subr.mxu0 %v85_v10  ;;  %451 = vmatpush3.msra.mxu1 %v197_v22 }
  0x33   :  { %420 = vmatpush3.msra.mxu0 %v85_v10  ;;  %452 = vmatprep.subr.mxu1 %v196_v23 }
  0x34   :  { %421 = vmatprep.subr.mxu0 %v84_v11  ;;  %453 = vmatpush3.msra.mxu1 %v196_v23 }
  0x35   :  { %422 = vmatpush3.msra.mxu0 %v84_v11  ;;  %454 = vmatprep.subr.mxu1 %v195_v24 }
  0x36   :  { %423 = vmatprep.subr.mxu0 %v83_v12  ;;  %455 = vmatpush3.msra.mxu1 %v195_v24 }
  0x37   :  { %424 = vmatpush3.msra.mxu0 %v83_v12  ;;  %456 = vmatprep.subr.mxu1 %v194_v25 }
  0x38   :  { %425 = vmatprep.subr.mxu0 %v82_v13  ;;  %457 = vmatpush3.msra.mxu1 %v194_v25 }
  0x39   :  { %426 = vmatpush3.msra.mxu0 %v82_v13  ;;  %458 = vmatprep.subr.mxu1 %v193_v26  ;;  %v369_v13 = vld [vmem:[%s674_s5] ss:$0 sm:$0xff] }
  0x3a   :  { %427 = vmatprep.subr.mxu0 %v81_v14  ;;  %459 = vmatpush3.msra.mxu1 %v193_v26 }
  0x3b   :  { %428 = vmatpush3.msra.mxu0 %v81_v14  ;;  %460 = vmatprep.subr.mxu1 %v192_v27 }
  0x3c   :  { %429 = vmatprep.subr.mxu0 %v80_v15  ;;  %461 = vmatpush3.msra.mxu1 %v192_v27 }
  0x3d   :  { %430 = vmatpush3.msra.mxu0 %v80_v15  ;;  %462 = vmatprep.subr.mxu1 %v191_v28  ;;  %v370_v15 = vld [vmem:[%s675_s6] ss:$0 sm:$0xff] }
  0x3e   :  { %431 = vmatprep.subr.mxu0 %v79_v16  ;;  %463 = vmatpush3.msra.mxu1 %v191_v28 }
  0x3f   :  { %432 = vmatpush3.msra.mxu0 %v79_v16  ;;  %464 = vmatprep.subr.mxu1 %v190_v29 }
  0x40   :  { %433 = vmatprep.subr.mxu0 %v78_v17  ;;  %465 = vmatpush3.msra.mxu1 %v190_v29 }
  0x41   :  { %434 = vmatpush3.msra.mxu0 %v78_v17  ;;  %466 = vmatprep.subr.mxu1 %v189_v30 }
  0x42   :  { %435 = vmatprep.subr.mxu0 %v77_v18  ;;  %467 = vmatpush3.msra.mxu1 %v189_v30 }
  0x43   :  { %436 = vmatpush3.msra.mxu0 %v77_v18  ;;  %468 = vmatprep.subr.mxu1 %v188_v31 }
  0x44   :  { %437 = vmatprep.subr.mxu0 %v76_v19  ;;  %469 = vmatpush3.msra.mxu1 %v188_v31 }
  0x45   :  { %438 = vmatpush3.msra.mxu0 %v76_v19  ;;  %470 = vmatprep.subr.mxu1 %v187_v32 }
  0x46   :  { %440 = vmatmul.mubr.f32.vlgmr.msra.gmra.mxu0 %v646_v20  ;;  %471 = vmatpush3.msra.mxu1 %v187_v32 }
  0x47   :  { %472 = vmatprep.subr.mxu1 %v186_v33 }
  0x48   :  { %473 = vmatpush3.msra.mxu1 %v186_v33 }
 0x106   :  { %v441_v35 = vpop.f32.mrf.mxu0 }
 0x107   :  { %v171_v36 = vadd.f32 %v441_v35, %v366_v34 }
 0x108   :  { %v165_v37 = vpop.f32.mrf.mxu0 }
 0x109   :  { %v177_v38 = vmul.f32 0.70710677, %v171_v36  ;;  %v166_v39 = vadd.f32 %v366_v34, %v165_v37  ;;  %v175_v46 = vmul.f32 0.5, %v171_v36 }
 0x10b   :  { %484 = verf.f32 %v177_v38  ;;  %v176_v40 = vmul.f32 0.70710677, %v166_v39  ;;  %v174_v44 = vmul.f32 0.5, %v166_v39 }
 0x10d   :  { %486 = verf.f32 %v176_v40 }
 0x118   :  { %v485_v41 = vpop.eup %484 }
 0x119   :  { %v181_v43 = vadd.f32 1.0, %v485_v41 }
 0x11a   :  { %v487_v42 = vpop.eup %486 }
 0x11b   :  { %v180_v45 = vadd.f32 1.0, %v487_v42  ;;  %v183_v48 = vmul.f32 %v181_v43, %v175_v46 }
 0x11d   :  { %v182_v47 = vmul.f32 %v180_v45, %v174_v44 }
 0x11f   :  { %474 = vmatprep.mubr.f32.mxu1 %v182_v47 }
 0x120   :  { %475 = vmatmul.mubr.f32.vlgmr.msra.gmra.mxu1 %v183_v48 }
 0x1e0   :  { %v476_v49 = vpop.f32.mrf.mxu1 }
 0x1e1   :  { %v294_v53 = vadd.f32 %v476_v49, %v367_v50 }
 0x1e2   :  { %v268_v51 = vpop.f32.mrf.mxu1 }
 0x1e3   :  { %v293_v52 = vadd.f32 %v367_v50, %v268_v51  ;;  %v298_v55 = vadd.f32 %v294_v53, %v646_v20 }
 0x1e5   :  { %v297_v54 = vadd.f32 %v293_v52, %v643_v4 }
 0x1e7   :  { %299 = vadd.xlane.f32.xlu0 %v297_v54 }
 0x1eb   :  { %301 = vadd.xlane.f32.xlu0 %v298_v55 }
 0x270   :  { %v300_v58 = vpop.xlane.xlu0 %299 }
 0x271   :  { %v303_v59 = vmul.f32 0.03125, %v300_v58 }
 0x273   :  { %v305_v62 = vsub.f32 %v297_v54, %v303_v59 }
 0x274   :  { %v302_v63 = vpop.xlane.xlu0 %301 }
 0x275   :  { %v304_v0 = vmul.f32 0.03125, %v302_v63  ;;  %v312_v1 = vmul.f32 %v368_v61, %v305_v62 }
 0x277   :  { %v306_v2 = vsub.f32 %v298_v55, %v304_v0  ;;  %v314_v3 = vmul.f32 %v312_v1, %v312_v1 }
 0x279   :  { %316 = vadd.xlane.f32.xlu1 %v314_v3  ;;  %v313_v5 = vmul.f32 %v368_v61, %v306_v2 }
 0x27b   :  { %v315_v4 = vmul.f32 %v313_v5, %v313_v5 }
 0x27d   :  { %318 = vadd.xlane.f32.xlu1 %v315_v4 }
 0x302   :  { %v317_v6 = vpop.xlane.xlu1 %316 }
 0x303   :  { %v320_v7 = vmul.f32 0.03125, %v317_v6 }
 0x305   :  { %v322_v8 = vadd.f32 1e-12, %v320_v7 }
 0x306   :  { %v319_v9 = vpop.xlane.xlu1 %318 }
 0x307   :  { %488 = vrsqrt.f32 %v322_v8  ;;  %v321_v10 = vmul.f32 0.03125, %v319_v9 }
 0x309   :  { %v323_v11 = vadd.f32 1e-12, %v321_v10 }
 0x30b   :  { %490 = vrsqrt.f32 %v323_v11 }
 0x314   :  { %v489_v12 = vpop.eup %488 }
 0x315   :  { %v326_v14 = vmul.f32 %v489_v12, %v312_v1 }
 0x317   :  { %v335_v16 = vmul.f32 %v369_v13, %v326_v14 }
 0x318   :  { %v491_v17 = vpop.eup %490 }
 0x319   :  { %v327_v18 = vmul.f32 %v491_v17, %v313_v5  ;;  %v344_v19 = vadd.f32 %v370_v15, %v335_v16 }
 0x31b   :  { %v336_v20 = vmul.f32 %v369_v13, %v327_v18  ;;  %346 = vst [vmem:[#allocation9] sm:$0xff] %v344_v19 }
 0x31d   :  { %v345_v21 = vadd.f32 %v370_v15, %v336_v20 }
 0x31f   :  { %347 = vst [vmem:[#allocation9 + $0x8] sm:$0xff] %v345_v21 }
 0x320   :  { %563 = shalt.err (!%p560_p5)
}
 0x321   :  { %359 = dma.vmem_to_hbm [thread:$0]  %s354_s22, 256, %s676_s7, [#allocation5], %s580_s29, %s580_s29, %s581_s30  }
 0x322   :  { %576 = dma.done.wait [#allocation5], 256  }
 0x323   :  { %577 = vsyncadd [#allocation5], 4294967040 }
 0x324   :  { %363 = vsyncpa [#allocation4], 1 }
 0x325   :  { %364 = vsyncpa [#allocation7], 1 }
 0x326   :  { %365 = vsyncpa [#allocation5], 1 }

// kernel: tpu_custom_call.1
= control target key start
LH: loop header
LB: loop body
LE: loop exit
PB: predicated region body
PF: predicated region fallthrough
CT: control target
= control target key end

     0   :  { %12 = vsyncpa [#allocation4], 0  ;;  %s669_s0 = inlined_call_operand.hbm [shape: f32[16,128], index: 0, kind: input, shape index: {}]   ;;  %s670_s1 = inlined_call_operand.hbm [shape: f32[128,128], index: 1, kind: input, shape index: {}]   ;;  %s671_s2 = inlined_call_operand.vmem [shape: f32[1,128], index: 2, kind: input, shape index: {}]   ;;  %s672_s3 = inlined_call_operand.hbm [shape: f32[128,128], index: 3, kind: input, shape index: {}]   ;;  %s673_s4 = inlined_call_operand.vmem [shape: f32[1,128], index: 4, kind: input, shape index: {}]   ;;  %s674_s5 = inlined_call_operand.vmem [shape: f32[1,128], index: 5, kind: input, shape index: {}]   ;;  %s675_s6 = inlined_call_operand.vmem [shape: f32[1,128], index: 6, kind: input, shape index: {}]   ;;  %s676_s7 = inlined_call_operand.hbm [shape: f32[16,128], index: 7, kind: output, shape index: {}]  }
   0x1   :  { %13 = vsyncpa [#allocation7], 0 }
   0x2   :  { %14 = vsyncpa [#allocation5], 0  ;;  %s578_s24 = smov [#allocation6]   ;;  %s579_s26 = smov [#allocation3]  }
   0x3   :  { %s32_s25 = sshll.u32 %s578_s24, 4  ;;  %s20_s27 = sshll.u32 %s579_s26, 4  ;;  %s33_s25 = int_to_ptr.vmem [resolvable:$true] %s32_s25  ;;  %s21_s27 = int_to_ptr.vmem [resolvable:$true] %s20_s27 }
   0x4   :  { %s500_s28 = scalar_lea.vmem %s33_s25, 2048  ;;  %p505_p1 = scmp.lt.s32.totalorder %s33_s25, %s33_s25 }
   0x5   :  { %p501_p0 = scmp.ne.s32.totalorder %s33_s25, %s500_s28  ;;  %p506_p2 = scmp.lt.s32.totalorder %s500_s28, %s500_s28 }
   0x7   :  { %p507_p3 = por %p506_p2, %p505_p1 }
   0x9   :  { %p508_p4 = pnand %p507_p3, %p501_p0 }
   0xb   :  { %511 = shalt.err (!%p508_p4)
}
   0xc   :  { %s580_s29 = smov 128   ;;  %s581_s30 = smov 8  }
   0xd   :  { %38 = dma.hbm_to_vmem [thread:$0]  %s670_s1, 2048, %s33_s25, [#allocation7], %s580_s29, %s580_s29, %s581_s30  }
   0xe   :  { %s520_s10 = scalar_lea.vmem %s21_s27, 256  ;;  %p525_p6 = scmp.lt.s32.totalorder %s21_s27, %s21_s27 }
   0xf   :  { %p521_p5 = scmp.ne.s32.totalorder %s21_s27, %s520_s10  ;;  %p526_p7 = scmp.lt.s32.totalorder %s520_s10, %s520_s10 }
  0x11   :  { %p527_p8 = por %p526_p7, %p525_p6 }
  0x13   :  { %p528_p9 = pnand %p527_p8, %p521_p5 }
  0x15   :  { %531 = shalt.err (!%p528_p9)
}
  0x16   :  { %26 = dma.hbm_to_vmem [thread:$0]  %s669_s0, 256, %s21_s27, [#allocation4], %s580_s29, %s580_s29, %s581_s30  }
  0x17   :  { %s582_s13 = smov [#allocation8]  }
  0x18   :  { %s46_s14 = sshll.u32 %s582_s13, 4  ;;  %s47_s14 = int_to_ptr.vmem [resolvable:$true] %s46_s14 }
  0x19   :  { %s540_s15 = scalar_lea.vmem %s47_s14, 2048  ;;  %p545_p11 = scmp.lt.s32.totalorder %s47_s14, %s47_s14 }
  0x1a   :  { %p541_p10 = scmp.ne.s32.totalorder %s47_s14, %s540_s15  ;;  %p546_p12 = scmp.lt.s32.totalorder %s540_s15, %s540_s15 }
  0x1c   :  { %p547_p13 = por %p546_p12, %p545_p11 }
  0x1e   :  { %p548_p0 = pnand %p547_p13, %p541_p10 }
  0x20   :  { %551 = shalt.err (!%p548_p0)
}
  0x21   :  { %52 = dma.hbm_to_vmem [thread:$0]  %s672_s3, 2048, %s47_s14, [#allocation7], %s580_s29, %s580_s29, %s581_s30  }
  0x22   :  { %572 = dma.done.wait [#allocation4], 256  }
  0x23   :  { %573 = vsyncadd [#allocation4], 4294967040 }
  0x24   :  { %574 = dma.done.wait [#allocation7], 4096  }
  0x25   :  { %575 = vsyncadd [#allocation7], 4294963200  ;;  %v91_v0 = vld [vmem:[#allocation6 + $0x78] sm:$0xff]  ;;  %v90_v1 = vld [vmem:[#allocation6 + $0x70] sm:$0xff]  ;;  %v307_v56 = vlaneseq  ;;  %v583_v60 = vmov 0.0   ;;  %s584_s21 = smov [#allocation9]  }
  0x26   :  { %407 = vmatprep.subr.mxu0 %v91_v0  ;;  %v89_v2 = vld [vmem:[#allocation6 + $0x68] sm:$0xff]  ;;  %v88_v3 = vld [vmem:[#allocation6 + $0x60] sm:$0xff]  ;;  %v643_v4 = vld [vmem:[#allocation3] sm:$0xff]  ;;  %s353_s22 = sshll.u32 %s584_s21, 4  ;;  %s354_s22 = int_to_ptr.vmem [resolvable:$true] %s353_s22 }
  0x27   :  { %408 = vmatpush3.msra.mxu0 %v91_v0  ;;  %v87_v5 = vld [vmem:[#allocation6 + $0x58] sm:$0xff]  ;;  %439 = vmatprep.mubr.f32.mxu0 %v643_v4  ;;  %v200_v7 = vld [vmem:[#allocation8 + $0x70] sm:$0xff]  ;;  %v199_v9 = vld [vmem:[#allocation8 + $0x68] sm:$0xff]  ;;  %v308_v57 = vand.u32 127, %v307_v56  ;;  %s552_s23 = scalar_lea.vmem %s354_s22, 256  ;;  %p557_p2 = scmp.lt.s32.totalorder %s354_s22, %s354_s22 }
  0x28   :  { %409 = vmatprep.subr.mxu0 %v90_v1  ;;  %v201_v6 = vld [vmem:[#allocation8 + $0x78] sm:$0xff]  ;;  %v86_v8 = vld [vmem:[#allocation6 + $0x50] sm:$0xff]  ;;  %v85_v10 = vld [vmem:[#allocation6 + $0x48] sm:$0xff]  ;;  %p553_p1 = scmp.ne.s32.totalorder %s354_s22, %s552_s23  ;;  %p558_p3 = scmp.lt.s32.totalorder %s552_s23, %s552_s23 }
  0x29   :  { %410 = vmatpush3.msra.mxu0 %v90_v1  ;;  %442 = vmatprep.subr.mxu1 %v201_v6  ;;  %v84_v11 = vld [vmem:[#allocation6 + $0x40] sm:$0xff]  ;;  %v83_v12 = vld [vmem:[#allocation6 + $0x38] sm:$0xff]  ;;  %v82_v13 = vld [vmem:[#allocation6 + $0x30] sm:$0xff]  ;;  %vm309_vm0 = vcmp.lt.s32.totalorder %v308_v57, 32 }
  0x2a   :  { %411 = vmatprep.subr.mxu0 %v89_v2  ;;  %443 = vmatpush3.msra.mxu1 %v201_v6  ;;  %v81_v14 = vld [vmem:[#allocation6 + $0x28] sm:$0xff]  ;;  %v80_v15 = vld [vmem:[#allocation6 + $0x20] sm:$0xff]  ;;  %v79_v16 = vld [vmem:[#allocation6 + $0x18] sm:$0xff]  ;;  %v368_v61 = vsel %vm309_vm0, 1.0, %v583_v60  ;;  %p559_p4 = por %p558_p3, %p557_p2 }
  0x2b   :  { %412 = vmatpush3.msra.mxu0 %v89_v2  ;;  %444 = vmatprep.subr.mxu1 %v200_v7  ;;  %v78_v17 = vld [vmem:[#allocation6 + $0x10] sm:$0xff]  ;;  %v77_v18 = vld [vmem:[#allocation6 + $0x8] sm:$0xff]  ;;  %v76_v19 = vld [vmem:[#allocation6] sm:$0xff] }
  0x2c   :  { %413 = vmatprep.subr.mxu0 %v88_v3  ;;  %445 = vmatpush3.msra.mxu1 %v200_v7  ;;  %v646_v20 = vld [vmem:[#allocation3 + $0x8] sm:$0xff]  ;;  %v198_v21 = vld [vmem:[#allocation8 + $0x60] sm:$0xff]  ;;  %v196_v23 = vld [vmem:[#allocation8 + $0x50] sm:$0xff]  ;;  %p560_p5 = pnand %p559_p4, %p553_p1 }
  0x2d   :  { %414 = vmatpush3.msra.mxu0 %v88_v3  ;;  %446 = vmatprep.subr.mxu1 %v199_v9  ;;  %v197_v22 = vld [vmem:[#allocation8 + $0x58] sm:$0xff]  ;;  %v195_v24 = vld [vmem:[#allocation8 + $0x48] sm:$0xff]  ;;  %v194_v25 = vld [vmem:[#allocation8 + $0x40] sm:$0xff] }
  0x2e   :  { %415 = vmatprep.subr.mxu0 %v87_v5  ;;  %447 = vmatpush3.msra.mxu1 %v199_v9  ;;  %v193_v26 = vld [vmem:[#allocation8 + $0x38] sm:$0xff]  ;;  %v192_v27 = vld [vmem:[#allocation8 + $0x30] sm:$0xff]  ;;  %v191_v28 = vld [vmem:[#allocation8 + $0x28] sm:$0xff] }
  0x2f   :  { %416 = vmatpush3.msra.mxu0 %v87_v5  ;;  %448 = vmatprep.subr.mxu1 %v198_v21  ;;  %v190_v29 = vld [vmem:[#allocation8 + $0x20] sm:$0xff]  ;;  %v189_v30 = vld [vmem:[#allocation8 + $0x18] sm:$0xff]  ;;  %v188_v31 = vld [vmem:[#allocation8 + $0x10] sm:$0xff] }
  0x30   :  { %417 = vmatprep.subr.mxu0 %v86_v8  ;;  %449 = vmatpush3.msra.mxu1 %v198_v21  ;;  %v187_v32 = vld [vmem:[#allocation8 + $0x8] sm:$0xff]  ;;  %v186_v33 = vld [vmem:[#allocation8] sm:$0xff]  ;;  %v366_v34 = vld [vmem:[%s671_s2] ss:$0 sm:$0xff] }
  0x31   :  { %418 = vmatpush3.msra.mxu0 %v86_v8  ;;  %450 = vmatprep.subr.mxu1 %v197_v22  ;;  %v367_v50 = vld [vmem:[%s673_s4] ss:$0 sm:$0xff] }
  0x32   :  { %419 = vmatprep.subr.mxu0 %v85_v10  ;;  %451 = vmatpush3.msra.mxu1 %v197_v22 }
  0x33   :  { %420 = vmatpush3.msra.mxu0 %v85_v10  ;;  %452 = vmatprep.subr.mxu1 %v196_v23 }
  0x34   :  { %421 = vmatprep.subr.mxu0 %v84_v11  ;;  %453 = vmatpush3.msra.mxu1 %v196_v23 }
  0x35   :  { %422 = vmatpush3.msra.mxu0 %v84_v11  ;;  %454 = vmatprep.subr.mxu1 %v195_v24 }
  0x36   :  { %423 = vmatprep.subr.mxu0 %v83_v12  ;;  %455 = vmatpush3.msra.mxu1 %v195_v24 }
  0x37   :  { %424 = vmatpush3.msra.mxu0 %v83_v12  ;;  %456 = vmatprep.subr.mxu1 %v194_v25 }
  0x38   :  { %425 = vmatprep.subr.mxu0 %v82_v13  ;;  %457 = vmatpush3.msra.mxu1 %v194_v25 }
  0x39   :  { %426 = vmatpush3.msra.mxu0 %v82_v13  ;;  %458 = vmatprep.subr.mxu1 %v193_v26  ;;  %v369_v13 = vld [vmem:[%s674_s5] ss:$0 sm:$0xff] }
  0x3a   :  { %427 = vmatprep.subr.mxu0 %v81_v14  ;;  %459 = vmatpush3.msra.mxu1 %v193_v26 }
  0x3b   :  { %428 = vmatpush3.msra.mxu0 %v81_v14  ;;  %460 = vmatprep.subr.mxu1 %v192_v27 }
  0x3c   :  { %429 = vmatprep.subr.mxu0 %v80_v15  ;;  %461 = vmatpush3.msra.mxu1 %v192_v27 }
  0x3d   :  { %430 = vmatpush3.msra.mxu0 %v80_v15  ;;  %462 = vmatprep.subr.mxu1 %v191_v28  ;;  %v370_v15 = vld [vmem:[%s675_s6] ss:$0 sm:$0xff] }
  0x3e   :  { %431 = vmatprep.subr.mxu0 %v79_v16  ;;  %463 = vmatpush3.msra.mxu1 %v191_v28 }
  0x3f   :  { %432 = vmatpush3.msra.mxu0 %v79_v16  ;;  %464 = vmatprep.subr.mxu1 %v190_v29 }
  0x40   :  { %433 = vmatprep.subr.mxu0 %v78_v17  ;;  %465 = vmatpush3.msra.mxu1 %v190_v29 }
  0x41   :  { %434 = vmatpush3.msra.mxu0 %v78_v17  ;;  %466 = vmatprep.subr.mxu1 %v189_v30 }
  0x42   :  { %435 = vmatprep.subr.mxu0 %v77_v18  ;;  %467 = vmatpush3.msra.mxu1 %v189_v30 }
  0x43   :  { %436 = vmatpush3.msra.mxu0 %v77_v18  ;;  %468 = vmatprep.subr.mxu1 %v188_v31 }
  0x44   :  { %437 = vmatprep.subr.mxu0 %v76_v19  ;;  %469 = vmatpush3.msra.mxu1 %v188_v31 }
  0x45   :  { %438 = vmatpush3.msra.mxu0 %v76_v19  ;;  %470 = vmatprep.subr.mxu1 %v187_v32 }
  0x46   :  { %440 = vmatmul.mubr.f32.vlgmr.msra.gmra.mxu0 %v646_v20  ;;  %471 = vmatpush3.msra.mxu1 %v187_v32 }
  0x47   :  { %472 = vmatprep.subr.mxu1 %v186_v33 }
  0x48   :  { %473 = vmatpush3.msra.mxu1 %v186_v33 }
 0x106   :  { %v441_v35 = vpop.f32.mrf.mxu0 }
 0x107   :  { %v171_v36 = vadd.f32 %v441_v35, %v366_v34 }
 0x108   :  { %v165_v37 = vpop.f32.mrf.mxu0 }
 0x109   :  { %v177_v38 = vmul.f32 0.70710677, %v171_v36  ;;  %v166_v39 = vadd.f32 %v366_v34, %v165_v37  ;;  %v175_v46 = vmul.f32 0.5, %v171_v36 }
 0x10b   :  { %484 = verf.f32 %v177_v38  ;;  %v176_v40 = vmul.f32 0.70710677, %v166_v39  ;;  %v174_v44 = vmul.f32 0.5, %v166_v39 }
 0x10d   :  { %486 = verf.f32 %v176_v40 }
 0x118   :  { %v485_v41 = vpop.eup %484 }
 0x119   :  { %v181_v43 = vadd.f32 1.0, %v485_v41 }
 0x11a   :  { %v487_v42 = vpop.eup %486 }
 0x11b   :  { %v180_v45 = vadd.f32 1.0, %v487_v42  ;;  %v183_v48 = vmul.f32 %v181_v43, %v175_v46 }
 0x11d   :  { %v182_v47 = vmul.f32 %v180_v45, %v174_v44 }
 0x11f   :  { %474 = vmatprep.mubr.f32.mxu1 %v182_v47 }
 0x120   :  { %475 = vmatmul.mubr.f32.vlgmr.msra.gmra.mxu1 %v183_v48 }
 0x1e0   :  { %v476_v49 = vpop.f32.mrf.mxu1 }
 0x1e1   :  { %v294_v53 = vadd.f32 %v476_v49, %v367_v50 }
 0x1e2   :  { %v268_v51 = vpop.f32.mrf.mxu1 }
 0x1e3   :  { %v293_v52 = vadd.f32 %v367_v50, %v268_v51  ;;  %v298_v55 = vadd.f32 %v294_v53, %v646_v20 }
 0x1e5   :  { %v297_v54 = vadd.f32 %v293_v52, %v643_v4 }
 0x1e7   :  { %299 = vadd.xlane.f32.xlu0 %v297_v54 }
 0x1eb   :  { %301 = vadd.xlane.f32.xlu0 %v298_v55 }
 0x270   :  { %v300_v58 = vpop.xlane.xlu0 %299 }
 0x271   :  { %v303_v59 = vmul.f32 0.03125, %v300_v58 }
 0x273   :  { %v305_v62 = vsub.f32 %v297_v54, %v303_v59 }
 0x274   :  { %v302_v63 = vpop.xlane.xlu0 %301 }
 0x275   :  { %v304_v0 = vmul.f32 0.03125, %v302_v63  ;;  %v312_v1 = vmul.f32 %v368_v61, %v305_v62 }
 0x277   :  { %v306_v2 = vsub.f32 %v298_v55, %v304_v0  ;;  %v314_v3 = vmul.f32 %v312_v1, %v312_v1 }
 0x279   :  { %316 = vadd.xlane.f32.xlu1 %v314_v3  ;;  %v313_v5 = vmul.f32 %v368_v61, %v306_v2 }
 0x27b   :  { %v315_v4 = vmul.f32 %v313_v5, %v313_v5 }
 0x27d   :  { %318 = vadd.xlane.f32.xlu1 %v315_v4 }
 0x302   :  { %v317_v6 = vpop.xlane.xlu1 %316 }
 0x303   :  { %v320_v7 = vmul.f32 0.03125, %v317_v6 }
 0x305   :  { %v322_v8 = vadd.f32 1e-12, %v320_v7 }
 0x306   :  { %v319_v9 = vpop.xlane.xlu1 %318 }
 0x307   :  { %488 = vrsqrt.f32 %v322_v8  ;;  %v321_v10 = vmul.f32 0.03125, %v319_v9 }
 0x309   :  { %v323_v11 = vadd.f32 1e-12, %v321_v10 }
 0x30b   :  { %490 = vrsqrt.f32 %v323_v11 }
 0x314   :  { %v489_v12 = vpop.eup %488 }
 0x315   :  { %v326_v14 = vmul.f32 %v489_v12, %v312_v1 }
 0x317   :  { %v335_v16 = vmul.f32 %v369_v13, %v326_v14 }
 0x318   :  { %v491_v17 = vpop.eup %490 }
 0x319   :  { %v327_v18 = vmul.f32 %v491_v17, %v313_v5  ;;  %v344_v19 = vadd.f32 %v370_v15, %v335_v16 }
 0x31b   :  { %v336_v20 = vmul.f32 %v369_v13, %v327_v18  ;;  %346 = vst [vmem:[#allocation9] sm:$0xff] %v344_v19 }
 0x31d   :  { %v345_v21 = vadd.f32 %v370_v15, %v336_v20 }
 0x31f   :  { %347 = vst [vmem:[#allocation9 + $0x8] sm:$0xff] %v345_v21 }
 0x320   :  { %563 = shalt.err (!%p560_p5)
}
 0x321   :  { %359 = dma.vmem_to_hbm [thread:$0]  %s354_s22, 256, %s676_s7, [#allocation5], %s580_s29, %s580_s29, %s581_s30  }
 0x322   :  { %576 = dma.done.wait [#allocation5], 256  }
 0x323   :  { %577 = vsyncadd [#allocation5], 4294967040 }
 0x324   :  { %363 = vsyncpa [#allocation4], 1 }
 0x325   :  { %364 = vsyncpa [#allocation7], 1 }
 0x326   :  { %365 = vsyncpa [#allocation5], 1 }

</bundles_post_ra>
